<compile_context>
chip_gen: v7x
topology: tpu7x:2x2x1
jax: 0.10.0
libtpu: 0.0.40
codegen_flags: <defaults>
</compile_context>

<pallas_src>
import functools

import jax
import jax.numpy as jnp
from jax import lax
from jax.experimental import pallas as pl
from jax.experimental.pallas import tpu as pltpu


# ----------------------------- kernels ------------------------------------


def _mv_attn_fused_kernel(x_ref, w_ref, b_ref, o_ref, *, num_views, mask_rows):
    """One grid step = one tile of views; full N*D row resident per block.

    x_ref : (tv, ND) VMEM   w_ref : (1, ND) VMEM   b_ref : (1,) SMEM
    o_ref : (1, ND)  VMEM resident accumulator (same block across the grid).
    """
    i = pl.program_id(0)

    @pl.when(i == 0)
    def _():
        o_ref[...] = jnp.zeros_like(o_ref)

    x = x_ref[...]                                           # (tv, ND)
    tv = x.shape[0]
    if mask_rows:
        # Last block may read past V: zero those rows (they then contribute 0
        # regardless of their omega).
        row = lax.broadcasted_iota(jnp.int32, (tv, 1), 0) + i * tv
        x = jnp.where(row < num_views, x, 0.0)

    # score[v] = <x_v, w>  -- VPU multiply + lane reduce (no skinny MXU column).
    score = jnp.sum(x * w_ref[...], axis=1, keepdims=True)   # (tv, 1)
    omega = jax.nn.sigmoid(score + b_ref[0])                 # (tv, 1)

    # result += sum_v omega[v] * x[v]  -- VPU multiply + sublane reduce.
    o_ref[...] += jnp.sum(omega * x, axis=0, keepdims=True)  # (1, ND)


def _scores_kernel(x_ref, w_ref, b_ref, s_ref, *, nd_total, tn, mask_lanes):
    """Split path, pass 1: partial scores over ND tiles (reduction axis)."""
    k = pl.program_id(0)

    @pl.when(k == 0)
    def _():
        s_ref[...] = jnp.zeros_like(s_ref)

    prod = x_ref[...] * w_ref[...]                           # (V, tn)
    if mask_lanes:
        lane = lax.broadcasted_iota(jnp.int32, (1, tn), 1) + k * tn
        prod = jnp.where(lane < nd_total, prod, 0.0)
    s_ref[...] += jnp.sum(prod, axis=1, keepdims=True)       # (V, 1)

    @pl.when(k == pl.num_programs(0) - 1)
    def _():
        s_ref[...] = jax.nn.sigmoid(s_ref[...] + b_ref[0])   # omega


def _weighted_sum_kernel(omega_ref, x_ref, o_ref):
    """Split path, pass 2: result[:, j-tile] = sum_v omega[v] * x[v, j-tile]."""
    o_ref[...] = jnp.sum(omega_ref[...] * x_ref[...], axis=0, keepdims=True)


# ----------------------------- wrapper -------------------------------------


def _vmem_capacity_bytes():
    try:
        return int(pltpu.get_tpu_info().vmem_capacity_bytes)
    except Exception:
        return 64 * 1024 * 1024  # conservative (v7x-sized) fallback


def _round_up(x, m):
    return ((x + m - 1) // m) * m


def mv_attn_forward(inputs, weight, bias, *, force_split=False,
                    block_budget_bytes=None):
    """inputs: [V, N, D]; weight: [1, N*D]; bias: [1]  ->  [N, D] float32."""
    V, N, D = inputs.shape
    ND = N * D
    if V == 0:
        return jnp.zeros((N, D), jnp.float32)

    x2d = inputs.reshape(V, ND).astype(jnp.float32)     # lane-dense views
    w2d = weight.reshape(1, ND).astype(jnp.float32)     # lane-dense weight
    b = bias.reshape(1).astype(jnp.float32)

    vmem_cap = _vmem_capacity_bytes()
    vmem_limit = (vmem_cap * 3) // 4          # ~96 MiB v5e/v6e, ~48 MiB v7x
    if block_budget_bytes is None:
        block_budget_bytes = vmem_limit // 8  # ~12 MiB v5e/v6e, ~6 MiB v7x / buffer

    def _params(sem):
        return pltpu.CompilerParams(
            dimension_semantics=sem, vmem_limit_bytes=int(vmem_limit))

    bytes_per_view = ND * 4
    tv_fit = block_budget_bytes // bytes_per_view

    if not force_split and tv_fit >= min(V, 8):
        # ---------- fused path: X read from HBM exactly once ----------
        if tv_fit >= V:
            tv = V                            # whole input in one block
        else:
            tv = (tv_fit // 8) * 8            # sublane-aligned, never > budget
        grid = (pl.cdiv(V, tv),)
        mask_rows = (V % tv) != 0
        kernel = functools.partial(
            _mv_attn_fused_kernel, num_views=V, mask_rows=mask_rows)
        out = pl.pallas_call(
            kernel,
            out_shape=jax.ShapeDtypeStruct((1, ND), jnp.float32),
            grid_spec=pltpu.PrefetchScalarGridSpec(
                num_scalar_prefetch=0,
                grid=grid,
                in_specs=[
                    pl.BlockSpec((tv, ND), lambda i: (i, 0)),
                    pl.BlockSpec((1, ND), lambda i: (0, 0)),
                    pl.BlockSpec(memory_space=pltpu.MemorySpace.SMEM),
                ],
                out_specs=pl.BlockSpec((1, ND), lambda i: (0, 0)),
            ),
            compiler_params=_params(("arbitrary",)),   # reduction over views
        )(x2d, w2d, b)
        return out.reshape(N, D)

    # ---------- split path: ND tiled (large N*D) ----------
    tn = block_budget_bytes // (V * 4)
    tn = max(128, (tn // 128) * 128)
    tn = min(tn, _round_up(ND, 128))
    nd_tiles = pl.cdiv(ND, tn)
    mask_lanes = (ND % tn) != 0

    # Pass 1: omega[v] = sigmoid(<x_v, w> + b), reduced over ND tiles.
    scores_kernel = functools.partial(
        _scores_kernel, nd_total=ND, tn=tn, mask_lanes=mask_lanes)
    omega = pl.pallas_call(
        scores_kernel,
        out_shape=jax.ShapeDtypeStruct((V, 1), jnp.float32),
        grid_spec=pltpu.PrefetchScalarGridSpec(
            num_scalar_prefetch=0,
            grid=(nd_tiles,),
            in_specs=[
                pl.BlockSpec((V, tn), lambda k: (0, k)),
                pl.BlockSpec((1, tn), lambda k: (0, k)),
                pl.BlockSpec(memory_space=pltpu.MemorySpace.SMEM),
            ],
            out_specs=pl.BlockSpec((V, 1), lambda k: (0, 0)),
        ),
        compiler_params=_params(("arbitrary",)),
    )(x2d, w2d, b)

    # Pass 2: weighted sum; ND axis is fully parallel (v7x 2-TC shardable).
    out = pl.pallas_call(
        _weighted_sum_kernel,
        out_shape=jax.ShapeDtypeStruct((1, ND), jnp.float32),
        grid_spec=pltpu.PrefetchScalarGridSpec(
            num_scalar_prefetch=0,
            grid=(nd_tiles,),
            in_specs=[
                pl.BlockSpec((V, 1), lambda j: (0, 0)),
                pl.BlockSpec((V, tn), lambda j: (0, j)),
            ],
            out_specs=pl.BlockSpec((1, tn), lambda j: (0, j)),
        ),
        compiler_params=_params(("parallel",)),
    )(omega, x2d)
    return out.reshape(N, D)


# ----------------------------- reference / test ----------------------------


def mv_attn_reference(inputs, weight, bias):
    V, N, D = inputs.shape
    flat = inputs.reshape(V, N * D).astype(jnp.float32)
    omega = jax.nn.sigmoid(flat @ weight.reshape(-1).astype(jnp.float32)
                           + bias.astype(jnp.float32)[0])        # (V,)
    return jnp.einsum("v,vnd->nd", omega, inputs.astype(jnp.float32))


if __name__ == "__main__":
    def run_case(num_views, num_nodes, embedding_dim, **kwargs):
        key = jax.random.PRNGKey(0)
        k_x, k_w, k_b = jax.random.split(key, 3)
        inputs = jax.random.normal(
            k_x, (num_views, num_nodes, embedding_dim), dtype=jnp.float32)
        fan_in = num_nodes * embedding_dim
        bound = 1.0 / (fan_in ** 0.5)
        weight = jax.random.uniform(
            k_w, (1, fan_in), minval=-bound, maxval=bound, dtype=jnp.float32)
        bias = jax.random.uniform(
            k_b, (1,), minval=-bound, maxval=bound, dtype=jnp.float32)

        out = jax.block_until_ready(mv_attn_forward(inputs, weight, bias, **kwargs))
        ref = mv_attn_reference(inputs, weight, bias)
        assert out.shape == (num_nodes, embedding_dim)
        assert jnp.allclose(out, ref, atol=1e-5, rtol=1e-5), "mismatch vs reference"

    # Primary small case: fused path, single grid step, X read once.
    run_case(4, 16, 32)
    # Fused path with multiple view tiles + in-kernel row masking (no host pad).
    run_case(12, 16, 32, block_budget_bytes=8 * 16 * 32 * 4)
    # Split (ND-tiled) path: "parallel" ND axis + ragged-tail lane masking.
    run_case(4, 16, 33, force_split=True, block_budget_bytes=4 * 128 * 4)

    print("KERNEL_OK")
</pallas_src>

<mosaic_0001>
module attributes {stable_mosaic.version = 11 : i64} {
  func.func @_mv_attn_fused_kernel(%arg0: i32, %arg1: memref<4x512xf32, #tpu.memory_space<vmem>>, %arg2: memref<1x512xf32, #tpu.memory_space<vmem>>, %arg3: memref<1xf32, #tpu.memory_space<smem>>, %arg4: memref<1x512xf32, #tpu.memory_space<vmem>>) attributes {dimension_semantics = [#tpu.dimension_semantics<arbitrary>], iteration_bounds = array<i64: 1>, scalar_prefetch = 0 : i64, scratch_operands = 0 : i64, tpu.core_type = #tpu.core_type<tc>, window_params = [{transform_indices = @transform_0, window_bounds = array<i64: 4, 512>}, {pipeline_mode = #tpu.pipeline_mode<synchronous>, transform_indices = @transform_1, window_bounds = array<i64: 1, 512>}, {transform_indices = @transform_2, window_bounds = array<i64: 1>}, {pipeline_mode = #tpu.pipeline_mode<synchronous>, transform_indices = @transform_3, window_bounds = array<i64: 1, 512>}]} {
    %c0_i32 = arith.constant 0 : i32
    %0 = arith.cmpi eq, %arg0, %c0_i32 : i32
    %1 = arith.extui %0 : i1 to i32
    %c0_i32_0 = arith.constant 0 : i32
    %2 = arith.cmpi ne, %1, %c0_i32_0 : i32
    scf.if %2 {
      %cst_11 = arith.constant 0.000000e+00 : f32
      %24 = vector.broadcast %cst_11 : f32 to vector<1x512xf32>
      %c0_12 = arith.constant 0 : index
      %c0_13 = arith.constant 0 : index
      %25 = vector.load %arg4[%c0_12, %c0_13] : memref<1x512xf32, #tpu.memory_space<vmem>>, vector<1x512xf32>
      tpu.vector_store %arg4[%c0_12, %c0_13], %24 {strides = array<i32>} : memref<1x512xf32, #tpu.memory_space<vmem>>, vector<1x512xf32>,
    } else {
    }
    %c0 = arith.constant 0 : index
    %c0_1 = arith.constant 0 : index
    %3 = vector.load %arg1[%c0, %c0_1] : memref<4x512xf32, #tpu.memory_space<vmem>>, vector<4x512xf32>
    %c0_2 = arith.constant 0 : index
    %c0_3 = arith.constant 0 : index
    %4 = vector.load %arg2[%c0_2, %c0_3] : memref<1x512xf32, #tpu.memory_space<vmem>>, vector<1x512xf32>
    %5 = vector.broadcast %4 : vector<1x512xf32> to vector<4x512xf32>
    %6 = arith.mulf %3, %5 : vector<4x512xf32>
    %cst = arith.constant dense<0.000000e+00> : vector<4xf32>
    %7 = vector.multi_reduction <add>, %6, %cst [1] : vector<4x512xf32> to vector<4xf32>
    %8 = vector.shape_cast %7 : vector<4xf32> to vector<4x1xf32>
    %c0_4 = arith.constant 0 : index
    %9 = memref.load %arg3[%c0_4] : memref<1xf32, #tpu.memory_space<smem>>
    %10 = vector.broadcast %9 : f32 to vector<4x1xf32>
    %11 = arith.addf %8, %10 : vector<4x1xf32>
    %12 = arith.negf %11 : vector<4x1xf32>
    %13 = math.exp %12 : vector<4x1xf32>
    %cst_5 = arith.constant 1.000000e+00 : f32
    %14 = vector.broadcast %cst_5 : f32 to vector<4x1xf32>
    %15 = arith.addf %14, %13 : vector<4x1xf32>
    %16 = arith.divf %14, %15 : vector<4x1xf32>
    %c0_6 = arith.constant 0 : index
    %c0_7 = arith.constant 0 : index
    %17 = vector.load %arg4[%c0_6, %c0_7] : memref<1x512xf32, #tpu.memory_space<vmem>>, vector<1x512xf32>
    %18 = vector.broadcast %16 : vector<4x1xf32> to vector<4x512xf32>
    %19 = arith.mulf %18, %3 : vector<4x512xf32>
    %cst_8 = arith.constant dense<0.000000e+00> : vector<512xf32>
    %20 = vector.multi_reduction <add>, %19, %cst_8 [0] : vector<4x512xf32> to vector<512xf32>
    %21 = vector.shape_cast %20 : vector<512xf32> to vector<1x512xf32>
    %22 = arith.addf %17, %21 : vector<1x512xf32>
    %c0_9 = arith.constant 0 : index
    %c0_10 = arith.constant 0 : index
    %23 = vector.load %arg4[%c0_9, %c0_10] : memref<1x512xf32, #tpu.memory_space<vmem>>, vector<1x512xf32>
    tpu.vector_store %arg4[%c0_9, %c0_10], %22 {strides = array<i32>} : memref<1x512xf32, #tpu.memory_space<vmem>>, vector<1x512xf32>,
    return
  }
  func.func @transform_0(%arg0: i32) -> (i32, i32) {
    %c0_i32 = arith.constant 0 : i32
    %c0_i32_0 = arith.constant 0 : i32
    return %arg0, %c0_i32 : i32, i32
  }
  func.func @transform_1(%arg0: i32) -> (i32, i32) {
    %c0_i32 = arith.constant 0 : i32
    %c0_i32_0 = arith.constant 0 : i32
    %c0_i32_1 = arith.constant 0 : i32
    return %c0_i32, %c0_i32_0 : i32, i32
  }
  func.func @transform_2(%arg0: i32) -> i32 {
    %c0_i32 = arith.constant 0 : i32
    %c0_i32_0 = arith.constant 0 : i32
    return %c0_i32 : i32
  }
  func.func @transform_3(%arg0: i32) -> (i32, i32) {
    %c0_i32 = arith.constant 0 : i32
    %c0_i32_0 = arith.constant 0 : i32
    %c0_i32_1 = arith.constant 0 : i32
    return %c0_i32, %c0_i32_0 : i32, i32
  }
}

</mosaic_0001>

<bundles_post_ra>
// kernel: tpu_custom_call.1
= control target key start
LH: loop header
LB: loop body
LE: loop exit
PB: predicated region body
PF: predicated region fallthrough
CT: control target
= control target key end

     0   :  { %9 = vsyncpa [#allocation4], 0  ;;  %s313_s0 = inlined_call_operand.hbm [shape: f32[4,512], index: 0, kind: input, shape index: {}]   ;;  %s314_s1 = inlined_call_operand.vmem [shape: f32[1,512], index: 1, kind: input, shape index: {}]   ;;  %s315_s2 = inlined_call_operand.<no memory space> [shape: f32[1], index: 2, kind: input, shape index: {}]   ;;  %s316_s3 = inlined_call_operand.hbm [shape: f32[1,512], index: 3, kind: output, shape index: {}]  }
   0x1   :  { %10 = vsyncpa [#allocation5], 0  ;;  %s236_s12 = smov [#allocation3]   ;;  %s188_s16 = scalar_lea.hbm %s313_s0, 256 }
   0x2   :  { %s17_s13 = sshll.u32 %s236_s12, 4  ;;  %p189_p0 = scmp.ne.s32.totalorder %s313_s0, %s188_s16  ;;  %s18_s13 = int_to_ptr.vmem [resolvable:$true] %s17_s13 }
   0x3   :  { %p192_p1 = scmp.lt.u32.totalorder %s188_s16, %s313_s0 }
   0x5   :  { %p194_p2 = pnand %p192_p1, %p189_p0 }
   0x7   :  { %197 = shalt.err (!%p194_p2)
}
   0x8   :  { %s198_s21 = scalar_lea.vmem %s18_s13, 256  ;;  %p203_p4 = scmp.lt.s32.totalorder %s18_s13, %s18_s13 }
   0x9   :  { %p199_p3 = scmp.ne.s32.totalorder %s18_s13, %s198_s21  ;;  %p204_p5 = scmp.lt.s32.totalorder %s198_s21, %s198_s21 }
   0xb   :  { %p205_p6 = por %p204_p5, %p203_p4 }
   0xd   :  { %p206_p7 = pnand %p205_p6, %p199_p3 }
   0xf   :  { %209 = shalt.err (!%p206_p7)
}
  0x10   :  { %20 = dma.hbm_to_vmem [thread:$0]  %s313_s0, 256, %s18_s13, [#allocation4]  }
  0x11   :  { %232 = dma.done.wait [#allocation4], 256  }
  0x12   :  { %233 = vsyncadd [#allocation4], 4294967040  ;;  %v32_v0 = vlaneseq  ;;  %v39_v6 = vld [vmem:[%s314_s1] sm:$0xf]  ;;  %v38_v12 = vld [vmem:[#allocation3 + $0x8] sm:$0xff]  ;;  %vm69_vm0 = vcmask 1043456   ;;  %v80_v28 = vstv %s315_s2 }
  0x13   :  { %v37_v11 = vld [vmem:[#allocation3] sm:$0xff]  ;;  %v237_v27 = vmov 0.0   ;;  %v92_v35 = vcombine.high %v38_v12, %v38_v12  ;;  %v238_v49 = vmov 1966171168   ;;  %s239_s2 = smov [#allocation6]  }
  0x14   :  { %v272_v1 = vshrl.u32 %v32_v0, 7  ;;  %vm285_vm1 = vcmp.lt.s32.totalorder %v32_v0, 512  ;;  %v91_v34 = vcombine.high %v37_v11, %v37_v11  ;;  %v134_v50 = vunpack.c.l.s4 %v238_v49  ;;  %s168_s26 = sshll.u32 %s239_s2, 4  ;;  %s169_s26 = int_to_ptr.vmem [resolvable:$true] %s168_s26 }
  0x15   :  { %36 = vst.msk [vmem:[#allocation6] sm:$0xf] %vm285_vm1, %v237_v27  ;;  %s210_s27 = scalar_lea.vmem %s169_s26, 64  ;;  %p215_p9 = scmp.lt.s32.totalorder %s169_s26, %s169_s26 }
  0x16   :  { %v43_v2 = vsub.s32 0, %v272_v1  ;;  %v47_v3 = vsub.s32 1, %v272_v1  ;;  %v51_v4 = vsub.s32 2, %v272_v1  ;;  %v55_v5 = vsub.s32 3, %v272_v1  ;;  %p211_p8 = scmp.ne.s32.totalorder %s169_s26, %s210_s27  ;;  %p216_p10 = scmp.lt.s32.totalorder %s210_s27, %s210_s27 }
  0x17   :  { %v135_v59 = vunpack.c.0.s8 %v134_v50 }
  0x18   :  { %v44_v7 = vrot.slane %v39_v6, %v43_v2  ;;  %v48_v8 = vrot.slane %v39_v6, %v47_v3  ;;  %v52_v9 = vrot.slane %v39_v6, %v51_v4  ;;  %v56_v10 = vrot.slane %v39_v6, %v55_v5  ;;  %p217_p11 = por %p216_p10, %p215_p9 }
  0x19   :  { %v138_v5 = vsub.s32 %v135_v59, %v272_v1 }
  0x1a   :  { %v57_v13 = vcombine.low %v44_v7, %v48_v8  ;;  %v58_v14 = vcombine.low %v52_v9, %v56_v10  ;;  %p218_p12 = pnand %p217_p11, %p211_p8 }
  0x1c   :  { %v61_v15 = vmul.f32 %v57_v13, %v37_v11  ;;  %v62_v16 = vmul.f32 %v58_v14, %v38_v12 }
  0x1e   :  { %v65_v17 = vcombine.high %v61_v15, %v61_v15  ;;  %v66_v18 = vcombine.high %v62_v16, %v62_v16  ;;  %v70_v19 = vsel %vm69_vm0, %v61_v15, 0.0  ;;  %v73_v21 = vsel %vm69_vm0, %v62_v16, 0.0  ;;  %v88_v15 = vld [vmem:[#allocation6] sm:$0xf] }
  0x20   :  { %v71_v20 = vsel %vm69_vm0, %v65_v17, 0.0  ;;  %v75_v23 = vsel %vm69_vm0, %v66_v18, 0.0 }
  0x21   :  { %v72_v22 = vadd.f32 %v71_v20, %v70_v19 }
  0x23   :  { %v74_v24 = vadd.f32 %v73_v21, %v72_v22 }
  0x25   :  { %v76_v25 = vadd.f32 %v75_v23, %v74_v24 }
  0x27   :  { %77 = vadd.xlane.f32.xlu0 %v76_v25 }
  0xb4   :  { %v78_v29 = vpop.xlane.xlu0 %77 }
  0xb5   :  { %v81_v30 = vadd.f32 %v80_v28, %v78_v29 }
  0xb7   :  { %v177_v31 = vmul.f32 -1.442695, %v81_v30 }
  0xb9   :  { %184 = vpow2.f32 %v177_v31 }
  0xc3   :  { %v185_v32 = vpop.eup %184 }
  0xc4   :  { %v85_v33 = vadd.f32 1.0, %v185_v32 }
  0xc6   :  { %186 = vrcp.f32 %v85_v33 }
  0xd0   :  { %v187_v36 = vpop.eup %186 }
  0xd1   :  { %v95_v37 = vmul.f32 %v187_v36, %v37_v11  ;;  %v96_v38 = vmul.f32 %v187_v36, %v91_v34  ;;  %v97_v39 = vmul.f32 %v187_v36, %v38_v12  ;;  %v98_v40 = vmul.f32 %v187_v36, %v92_v35 }
  0xd3   :  { %v99_v41 = vsel %vm69_vm0, %v95_v37, 0.0  ;;  %v106_v42 = vsel %vm69_vm0, %v96_v38, 0.0  ;;  %v113_v43 = vsel %vm69_vm0, %v97_v39, 0.0  ;;  %v120_v44 = vsel %vm69_vm0, %v98_v40, 0.0 }
  0xd4   :  { %v100_v45 = vrot.slane %v99_v41, 4  ;;  %v107_v46 = vrot.slane %v106_v42, 4  ;;  %v114_v47 = vrot.slane %v113_v43, 4  ;;  %v121_v48 = vrot.slane %v120_v44, 4 }
  0xd6   :  { %v101_v51 = vadd.f32 %v100_v45, %v99_v41  ;;  %v108_v52 = vadd.f32 %v107_v46, %v106_v42  ;;  %v115_v53 = vadd.f32 %v114_v47, %v113_v43  ;;  %v122_v54 = vadd.f32 %v121_v48, %v120_v44 }
  0xd8   :  { %v102_v55 = vrot.slane %v101_v51, 2  ;;  %v109_v56 = vrot.slane %v108_v52, 2  ;;  %v116_v57 = vrot.slane %v115_v53, 2  ;;  %v123_v58 = vrot.slane %v122_v54, 2 }
  0xda   :  { %v103_v60 = vadd.f32 %v102_v55, %v101_v51  ;;  %v110_v61 = vadd.f32 %v109_v56, %v108_v52  ;;  %v117_v62 = vadd.f32 %v116_v57, %v115_v53  ;;  %v124_v63 = vadd.f32 %v123_v58, %v122_v54 }
  0xdc   :  { %v104_v0 = vrot.slane %v103_v60, 1  ;;  %v111_v2 = vrot.slane %v110_v61, 1  ;;  %v118_v3 = vrot.slane %v117_v62, 1  ;;  %v125_v4 = vrot.slane %v124_v63, 1 }
  0xde   :  { %v105_v6 = vadd.f32 %v104_v0, %v103_v60  ;;  %v112_v7 = vadd.f32 %v111_v2, %v110_v61  ;;  %v119_v8 = vadd.f32 %v118_v3, %v117_v62  ;;  %v126_v9 = vadd.f32 %v125_v4, %v124_v63 }
  0xe0   :  { %v131_v10 = vcombine.low %v105_v6, %v112_v7  ;;  %v132_v11 = vcombine.low %v119_v8, %v126_v9 }
  0xe2   :  { %v139_v12 = vrot.slane %v131_v10, %v138_v5  ;;  %v146_v13 = vrot.slane %v132_v11, %v138_v5 }
  0xe4   :  { %v147_v14 = vcombine.low %v139_v12, %v146_v13 }
  0xe6   :  { %v154_v16 = vrot.slane %v147_v14, %v138_v5 }
  0xe8   :  { %v156_v17 = vadd.f32 %v154_v16, %v88_v15 }
  0xea   :  { %161 = vst.msk [vmem:[#allocation6] sm:$0xf] %vm285_vm1, %v156_v17 }
  0xeb   :  { %221 = shalt.err (!%p218_p12)
}
  0xec   :  { %s222_s30 = scalar_lea.hbm %s316_s3, 64 }
  0xed   :  { %p223_p13 = scmp.ne.s32.totalorder %s316_s3, %s222_s30  ;;  %p226_p0 = scmp.lt.u32.totalorder %s222_s30, %s316_s3 }
  0xef   :  { %p228_p1 = pnand %p226_p0, %p223_p13 }
  0xf1   :  { %231 = shalt.err (!%p228_p1)
}
  0xf2   :  { %171 = dma.vmem_to_hbm [thread:$0]  %s169_s26, 64, %s316_s3, [#allocation5]  }
  0xf3   :  { %234 = dma.done.wait [#allocation5], 64  }
  0xf4   :  { %235 = vsyncadd [#allocation5], 4294967232 }
  0xf5   :  { %175 = vsyncpa [#allocation4], 1 }
  0xf6   :  { %176 = vsyncpa [#allocation5], 1 }

</bundles_post_ra>
